<compile_context>
chip_gen: v7x
topology: tpu7x:2x2x1
jax: 0.10.0
libtpu: 0.0.40
codegen_flags: <defaults>
</compile_context>

<pallas_src>
import math

import jax
import jax.numpy as jnp
from jax.experimental import pallas as pl
from jax.experimental.pallas import tpu as pltpu


def _normalize_kernel(x_ref, bias_ref, inv_std_ref, o_ref):
    # x_ref: (tile_rows, L) block.  bias_ref / inv_std_ref: (1, L) resident rows.
    # (x - mean) / std  ==  x * inv_std + (-mean * inv_std)
    x = x_ref[...].astype(jnp.float32)
    y = x * inv_std_ref[...] + bias_ref[...]
    o_ref[...] = y.astype(o_ref.dtype)


def _pick_dimension_semantics():
    """CORE_PARALLEL on v7x (2 TensorCores/chip), portable 'parallel' elsewhere."""
    try:
        kind = jax.devices()[0].device_kind.lower()
        if "v7" in kind:
            return (pltpu.CORE_PARALLEL,)
    except Exception:
        pass
    return ("parallel",)


def _launch(x2, bias_row, inv_std_row, *, tr, lanes, rows, dtype, semantics, alias):
    grid = (pl.cdiv(rows, tr),)
    return pl.pallas_call(
        _normalize_kernel,
        out_shape=jax.ShapeDtypeStruct((rows, lanes), dtype),
        grid_spec=pltpu.PrefetchScalarGridSpec(
            num_scalar_prefetch=0,
            grid=grid,
            in_specs=[
                pl.BlockSpec((tr, lanes), lambda i: (i, 0)),      # x: streamed
                pl.BlockSpec((1, lanes), lambda i: (0, 0)),       # bias: resident
                pl.BlockSpec((1, lanes), lambda i: (0, 0)),       # inv_std: resident
            ],
            out_specs=pl.BlockSpec((tr, lanes), lambda i: (i, 0)),
        ),
        input_output_aliases=({0: 0} if alias else {}),
        compiler_params=pltpu.CompilerParams(
            dimension_semantics=semantics,
            # Explicit limit: safe on every gen (v5e/v6e physical 128 MiB, v7x 64 MiB)
            # and lifts v5e's 16 MiB scoped default so 4 MiB blocks double-buffer.
            vmem_limit_bytes=48 << 20,
        ),
    )(x2, bias_row, inv_std_row)


def normalize(x: jax.Array, mean, std, *, target_lanes: int = 1024,
              block_byte_budget: int = 4 << 20) -> jax.Array:
    """(x - mean) / std with 1-D mean/std broadcast along the LAST axis of x."""
    orig_shape = x.shape
    dtype = x.dtype
    if not jnp.issubdtype(dtype, jnp.floating):
        raise TypeError("normalize expects a floating-point input dtype")
    c = orig_shape[-1]
    itemsize = jnp.dtype(dtype).itemsize

    # Host-side constant folding (per-channel constants, costs nothing).
    mean32 = jnp.asarray(mean, jnp.float32).reshape(c)
    std32 = jnp.asarray(std, jnp.float32).reshape(c)
    inv_std32 = 1.0 / std32
    bias32 = -mean32 * inv_std32

    # Lane-dense width: multiple of lcm(C, 128); prefer one that divides the
    # flattened size exactly so the pad/slice fallback (extra HBM traffic) is avoided.
    base = (c * 128) // math.gcd(c, 128)          # lcm(c, 128) -> multiple of 128
    total = x.size
    max_reps = max(1, target_lanes // base)
    reps = max_reps
    for r in range(max_reps, 0, -1):
        if total % (base * r) == 0:
            reps = r
            break
    lanes = base * reps

    x_flat = x.reshape(-1)
    pad = (-total) % lanes
    if pad:
        # TODO(synk): pad+slice costs an extra full read+write of the tensor; handle
        # the ragged tail with a second tiny pallas_call if this path ever matters.
        x_flat = jnp.pad(x_flat, (0, pad))
    rows = x_flat.shape[0] // lanes
    x2 = x_flat.reshape(rows, lanes)

    # Broadcast rows: column l of the slab always holds channel l % c.
    inv_std_row = jnp.tile(inv_std32, lanes // c).reshape(1, lanes)
    bias_row = jnp.tile(bias32, lanes // c).reshape(1, lanes)

    # dtype-aware sublane multiple (f32: 8, bf16/fp16: 16, 8-bit: 32).
    sub = max(8, 32 // itemsize)
    # VMEM-budget-driven row tile: ~block_byte_budget per block; double-buffered
    # input + output is ~4x that, well under the 48 MiB scoped-VMEM limit above.
    tr = max(sub, (block_byte_budget // (lanes * itemsize)) // sub * sub)
    rows_up = ((rows + sub - 1) // sub) * sub
    tr = min(tr, rows_up)

    semantics = _pick_dimension_semantics()
    try:
        out2 = _launch(x2, bias_row, inv_std_row, tr=tr, lanes=lanes, rows=rows,
                       dtype=dtype, semantics=semantics, alias=True)
    except Exception:
        # Conservative retry (portable semantics, no aliasing) guaranteed to run.
        out2 = _launch(x2, bias_row, inv_std_row, tr=tr, lanes=lanes, rows=rows,
                       dtype=dtype, semantics=("parallel",), alias=False)

    out_flat = out2.reshape(-1)
    if pad:
        out_flat = out_flat[:total]
    return out_flat.reshape(orig_shape)


if __name__ == "__main__":
    key = jax.random.PRNGKey(0)

    # Small image-like input, channels-last: (N, H, W, C) = (2, 16, 16, 4)
    n, h, w, c = 2, 16, 16, 4
    x = jax.random.uniform(key, (n, h, w, c), dtype=jnp.float32)

    # Deterministic per-channel mean/std (len == C, as the module implies).
    mean = (0.485, 0.456, 0.406, 0.5)
    std = (0.229, 0.224, 0.225, 0.25)

    # Reference computed BEFORE the kernel (output may alias the input slab).
    ref = (x - jnp.asarray(mean, jnp.float32)) / jnp.asarray(std, jnp.float32)
    ref = jax.block_until_ready(ref)

    y = normalize(x, mean, std)
    y = jax.block_until_ready(y)

    assert y.shape == x.shape and y.dtype == x.dtype
    assert jnp.allclose(y, ref, rtol=1e-5, atol=1e-6)

    print("KERNEL_OK")
</pallas_src>

<mosaic_0001>
module attributes {stable_mosaic.version = 11 : i64} {
  func.func @_normalize_kernel(%arg0: i32, %arg1: memref<8x1024xf32, #tpu.memory_space<vmem>>, %arg2: memref<1x1024xf32, #tpu.memory_space<vmem>>, %arg3: memref<1x1024xf32, #tpu.memory_space<vmem>>, %arg4: memref<8x1024xf32, #tpu.memory_space<vmem>>) attributes {dimension_semantics = [#tpu.dimension_semantics<parallel>], iteration_bounds = array<i64: 1>, scalar_prefetch = 0 : i64, scratch_operands = 0 : i64, tpu.core_type = #tpu.core_type<tc>, window_params = [{transform_indices = @transform_0, window_bounds = array<i64: 8, 1024>}, {pipeline_mode = #tpu.pipeline_mode<synchronous>, transform_indices = @transform_1, window_bounds = array<i64: 1, 1024>}, {pipeline_mode = #tpu.pipeline_mode<synchronous>, transform_indices = @transform_2, window_bounds = array<i64: 1, 1024>}, {transform_indices = @transform_3, window_bounds = array<i64: 8, 1024>}]} {
    %c0 = arith.constant 0 : index
    %c0_0 = arith.constant 0 : index
    %0 = vector.load %arg1[%c0, %c0_0] : memref<8x1024xf32, #tpu.memory_space<vmem>>, vector<8x1024xf32>
    %c0_1 = arith.constant 0 : index
    %c0_2 = arith.constant 0 : index
    %1 = vector.load %arg3[%c0_1, %c0_2] : memref<1x1024xf32, #tpu.memory_space<vmem>>, vector<1x1024xf32>
    %2 = vector.broadcast %1 : vector<1x1024xf32> to vector<8x1024xf32>
    %3 = arith.mulf %0, %2 : vector<8x1024xf32>
    %c0_3 = arith.constant 0 : index
    %c0_4 = arith.constant 0 : index
    %4 = vector.load %arg2[%c0_3, %c0_4] : memref<1x1024xf32, #tpu.memory_space<vmem>>, vector<1x1024xf32>
    %5 = vector.broadcast %4 : vector<1x1024xf32> to vector<8x1024xf32>
    %6 = arith.addf %3, %5 : vector<8x1024xf32>
    %c0_5 = arith.constant 0 : index
    %c0_6 = arith.constant 0 : index
    %7 = vector.load %arg4[%c0_5, %c0_6] : memref<8x1024xf32, #tpu.memory_space<vmem>>, vector<8x1024xf32>
    tpu.vector_store %arg4[%c0_5, %c0_6], %6 {strides = array<i32>} : memref<8x1024xf32, #tpu.memory_space<vmem>>, vector<8x1024xf32>,
    return
  }
  func.func @transform_0(%arg0: i32) -> (i32, i32) {
    %c0_i32 = arith.constant 0 : i32
    %c0_i32_0 = arith.constant 0 : i32
    return %arg0, %c0_i32 : i32, i32
  }
  func.func @transform_1(%arg0: i32) -> (i32, i32) {
    %c0_i32 = arith.constant 0 : i32
    %c0_i32_0 = arith.constant 0 : i32
    %c0_i32_1 = arith.constant 0 : i32
    return %c0_i32, %c0_i32_0 : i32, i32
  }
  func.func @transform_2(%arg0: i32) -> (i32, i32) {
    %c0_i32 = arith.constant 0 : i32
    %c0_i32_0 = arith.constant 0 : i32
    %c0_i32_1 = arith.constant 0 : i32
    return %c0_i32, %c0_i32_0 : i32, i32
  }
  func.func @transform_3(%arg0: i32) -> (i32, i32) {
    %c0_i32 = arith.constant 0 : i32
    %c0_i32_0 = arith.constant 0 : i32
    return %arg0, %c0_i32 : i32, i32
  }
}

module attributes {stable_mosaic.version = 11 : i64} {
  func.func @_normalize_kernel(%arg0: i32, %arg1: memref<8x1024xf32, #tpu.memory_space<vmem>>, %arg2: memref<1x1024xf32, #tpu.memory_space<vmem>>, %arg3: memref<1x1024xf32, #tpu.memory_space<vmem>>, %arg4: memref<8x1024xf32, #tpu.memory_space<vmem>>) attributes {dimension_semantics = [#tpu.dimension_semantics<parallel>], iteration_bounds = array<i64: 1>, scalar_prefetch = 0 : i64, scratch_operands = 0 : i64, tpu.core_type = #tpu.core_type<tc>, window_params = [{transform_indices = @transform_0, window_bounds = array<i64: 8, 1024>}, {pipeline_mode = #tpu.pipeline_mode<synchronous>, transform_indices = @transform_1, window_bounds = array<i64: 1, 1024>}, {pipeline_mode = #tpu.pipeline_mode<synchronous>, transform_indices = @transform_2, window_bounds = array<i64: 1, 1024>}, {transform_indices = @transform_3, window_bounds = array<i64: 8, 1024>}]} {
    %c0 = arith.constant 0 : index
    %c0_0 = arith.constant 0 : index
    %0 = vector.load %arg1[%c0, %c0_0] : memref<8x1024xf32, #tpu.memory_space<vmem>>, vector<8x1024xf32>
    %c0_1 = arith.constant 0 : index
    %c0_2 = arith.constant 0 : index
    %1 = vector.load %arg3[%c0_1, %c0_2] : memref<1x1024xf32, #tpu.memory_space<vmem>>, vector<1x1024xf32>
    %2 = vector.broadcast %1 : vector<1x1024xf32> to vector<8x1024xf32>
    %3 = arith.mulf %0, %2 : vector<8x1024xf32>
    %c0_3 = arith.constant 0 : index
    %c0_4 = arith.constant 0 : index
    %4 = vector.load %arg2[%c0_3, %c0_4] : memref<1x1024xf32, #tpu.memory_space<vmem>>, vector<1x1024xf32>
    %5 = vector.broadcast %4 : vector<1x1024xf32> to vector<8x1024xf32>
    %6 = arith.addf %3, %5 : vector<8x1024xf32>
    %c0_5 = arith.constant 0 : index
    %c0_6 = arith.constant 0 : index
    %7 = vector.load %arg4[%c0_5, %c0_6] : memref<8x1024xf32, #tpu.memory_space<vmem>>, vector<8x1024xf32>
    tpu.vector_store %arg4[%c0_5, %c0_6], %6 {strides = array<i32>} : memref<8x1024xf32, #tpu.memory_space<vmem>>, vector<8x1024xf32>,
    return
  }
  func.func @transform_0(%arg0: i32) -> (i32, i32) {
    %c0_i32 = arith.constant 0 : i32
    %c0_i32_0 = arith.constant 0 : i32
    return %arg0, %c0_i32 : i32, i32
  }
  func.func @transform_1(%arg0: i32) -> (i32, i32) {
    %c0_i32 = arith.constant 0 : i32
    %c0_i32_0 = arith.constant 0 : i32
    %c0_i32_1 = arith.constant 0 : i32
    return %c0_i32, %c0_i32_0 : i32, i32
  }
  func.func @transform_2(%arg0: i32) -> (i32, i32) {
    %c0_i32 = arith.constant 0 : i32
    %c0_i32_0 = arith.constant 0 : i32
    %c0_i32_1 = arith.constant 0 : i32
    return %c0_i32, %c0_i32_0 : i32, i32
  }
  func.func @transform_3(%arg0: i32) -> (i32, i32) {
    %c0_i32 = arith.constant 0 : i32
    %c0_i32_0 = arith.constant 0 : i32
    return %arg0, %c0_i32 : i32, i32
  }
}

</mosaic_0001>

<bundles_post_ra>
// kernel: tpu_custom_call.1
= control target key start
LH: loop header
LB: loop body
LE: loop exit
PB: predicated region body
PF: predicated region fallthrough
CT: control target
= control target key end

     0   :  { %8 = vsyncpa [#allocation3], 0  ;;  %s438_s0 = inlined_call_operand.hbm [shape: f32[2,1024], index: 0, kind: input, shape index: {}, may-alias: {0,3}]   ;;  %s439_s1 = inlined_call_operand.vmem [shape: f32[1,1024], index: 1, kind: input, shape index: {}]   ;;  %s440_s2 = inlined_call_operand.vmem [shape: f32[1,1024], index: 2, kind: input, shape index: {}]   ;;  %s441_s3 = inlined_call_operand.hbm [shape: f32[2,1024], index: 3, kind: output, shape index: {}, may-alias: {0,3}]  }
   0x1   :  { %9 = vsyncpa [#allocation4], 0 }
   0x2   :  { %14 = vsyncadd [#allocation3], 768  ;;  %s359_s12 = smov [#allocation2]   ;;  %s311_s16 = scalar_lea.hbm %s438_s0, 256 }
   0x3   :  { %s15_s13 = sshll.u32 %s359_s12, 4  ;;  %p312_p0 = scmp.ne.s32.totalorder %s438_s0, %s311_s16  ;;  %s16_s13 = int_to_ptr.vmem [resolvable:$true] %s15_s13 }
   0x4   :  { %p315_p1 = scmp.lt.u32.totalorder %s311_s16, %s438_s0 }
   0x6   :  { %p317_p2 = pnand %p315_p1, %p312_p0 }
   0x8   :  { %320 = shalt.err (!%p317_p2)
}
   0x9   :  { %s321_s21 = scalar_lea.vmem %s16_s13, 256  ;;  %s325_s22 = scalar_lea.vmem %s16_s13, 1024 }
   0xa   :  { %p322_p3 = scmp.ne.s32.totalorder %s16_s13, %s321_s21  ;;  %p326_p4 = scmp.lt.s32.totalorder %s16_s13, %s16_s13 }
   0xb   :  { %p327_p5 = scmp.lt.s32.totalorder %s325_s22, %s321_s21 }
   0xd   :  { %p328_p6 = por %p327_p5, %p326_p4 }
   0xf   :  { %p329_p7 = pnand %p328_p6, %p322_p3 }
  0x11   :  { %332 = shalt.err (!%p329_p7)
}
  0x12   :  { %s360_s23 = smov 256   ;;  %s361_s24 = smov 16  }
  0x13   :  { %21 = dma.hbm_to_vmem [thread:$0]  %s438_s0, 256, %s16_s13, [#allocation3], %s360_s23, %s360_s23, %s361_s24  }
  0x14   :  { %355 = dma.done.wait [#allocation3], 1024  }
  0x15   :  { %356 = vsyncadd [#allocation3], 4294966272  ;;  %v39_v0 = vlaneseq  ;;  %v362_v1 = vmov 1983009808   ;;  %v37_v11 = vld [vmem:[%s440_s2] sm:$0xff]  ;;  %v31_v45 = vld [vmem:[#allocation2 + $0x10] sm:$0xff] }
  0x16   :  { %v76_v2 = vunpack.c.l.s4 %v362_v1  ;;  %v159_v13 = vld [vmem:[%s439_s1] sm:$0xff]  ;;  %v30_v51 = vld [vmem:[#allocation2 + $0x8] sm:$0xff]  ;;  %v32_v54 = vld [vmem:[#allocation2 + $0x18] sm:$0xff] }
  0x17   :  { %v40_v3 = vshrl.u32 %v39_v0, 7  ;;  %v29_v36 = vld [vmem:[#allocation2] sm:$0xff] }
  0x18   :  { %v77_v4 = vunpack.c.0.s8 %v76_v2 }
  0x19   :  { %v41_v5 = vsub.s32 0, %v40_v3  ;;  %v45_v6 = vsub.s32 1, %v40_v3  ;;  %v49_v7 = vsub.s32 2, %v40_v3  ;;  %v53_v8 = vsub.s32 3, %v40_v3 }
  0x1a   :  { %v57_v9 = vsub.s32 4, %v40_v3  ;;  %v61_v10 = vsub.s32 5, %v40_v3  ;;  %v402_v12 = vsub.s32 %v77_v4, %v40_v3  ;;  %v65_v14 = vsub.s32 6, %v40_v3 }
  0x1b   :  { %v69_v15 = vsub.s32 7, %v40_v3  ;;  %v42_v16 = vrot.slane %v37_v11, %v41_v5  ;;  %v46_v17 = vrot.slane %v37_v11, %v45_v6  ;;  %v50_v18 = vrot.slane %v37_v11, %v49_v7 }
  0x1c   :  { %v54_v19 = vrot.slane %v37_v11, %v53_v8  ;;  %v164_v20 = vrot.slane %v159_v13, %v41_v5  ;;  %v168_v21 = vrot.slane %v159_v13, %v45_v6  ;;  %v172_v22 = vrot.slane %v159_v13, %v49_v7 }
  0x1d   :  { %v176_v23 = vrot.slane %v159_v13, %v53_v8  ;;  %v71_v24 = vcombine.low %v42_v16, %v46_v17  ;;  %v58_v26 = vrot.slane %v37_v11, %v57_v9  ;;  %v62_v27 = vrot.slane %v37_v11, %v61_v10  ;;  %v33_v8 = vld [vmem:[#allocation2 + $0x20] sm:$0xff] }
  0x1e   :  { %v73_v25 = vcombine.low %v50_v18, %v54_v19  ;;  %v193_v28 = vcombine.low %v164_v20, %v168_v21  ;;  %v66_v30 = vrot.slane %v37_v11, %v65_v14  ;;  %v70_v31 = vrot.slane %v37_v11, %v69_v15 }
  0x1f   :  { %v195_v29 = vcombine.low %v172_v22, %v176_v23  ;;  %v81_v32 = vrot.slane %v71_v24, %v402_v12  ;;  %v107_v34 = vcombine.low %v58_v26, %v62_v27  ;;  %v180_v35 = vrot.slane %v159_v13, %v57_v9 }
  0x20   :  { %v95_v33 = vrot.slane %v73_v25, %v402_v12  ;;  %v203_v37 = vrot.slane %v193_v28, %v402_v12  ;;  %v109_v39 = vcombine.low %v66_v30, %v70_v31  ;;  %v184_v40 = vrot.slane %v159_v13, %v61_v10  ;;  %v34_v25 = vld [vmem:[#allocation2 + $0x28] sm:$0xff]  ;;  %v36_v28 = vld [vmem:[#allocation2 + $0x38] sm:$0xff] }
  0x21   :  { %v217_v38 = vrot.slane %v195_v29, %v402_v12  ;;  %v117_v42 = vrot.slane %v107_v34, %v402_v12  ;;  %v188_v43 = vrot.slane %v159_v13, %v65_v14  ;;  %v192_v44 = vrot.slane %v159_v13, %v69_v15 }
  0x22   :  { %v103_v41 = vcombine.low %v81_v32, %v95_v33  ;;  %v131_v47 = vrot.slane %v109_v39, %v402_v12  ;;  %v229_v48 = vcombine.low %v180_v35, %v184_v40  ;;  %v104_v49 = vcombine.high %v81_v32, %v95_v33 }
  0x23   :  { %v225_v46 = vcombine.low %v203_v37, %v217_v38  ;;  %v231_v52 = vcombine.low %v188_v43, %v192_v44  ;;  %v226_v53 = vcombine.high %v203_v37, %v217_v38  ;;  %v72_v55 = vcombine.high %v42_v16, %v46_v17 }
  0x24   :  { %v151_v50 = vmul.f32 %v103_v41, %v29_v36  ;;  %v139_v56 = vcombine.low %v117_v42, %v131_v47  ;;  %v239_v57 = vrot.slane %v229_v48, %v402_v12  ;;  %v153_v58 = vmul.f32 %v104_v49, %v31_v45 }
  0x25   :  { %v140_v59 = vcombine.high %v117_v42, %v131_v47  ;;  %v253_v61 = vrot.slane %v231_v52, %v402_v12  ;;  %v74_v62 = vcombine.high %v50_v18, %v54_v19  ;;  %v88_v63 = vrot.slane %v72_v55, %v402_v12 }
  0x26   :  { %v273_v60 = vadd.f32 %v225_v46, %v151_v50  ;;  %v152_v0 = vmul.f32 %v139_v56, %v30_v51  ;;  %v275_v1 = vadd.f32 %v226_v53, %v153_v58  ;;  %v194_v3 = vcombine.high %v164_v20, %v168_v21 }
  0x27   :  { %v154_v2 = vmul.f32 %v140_v59, %v32_v54  ;;  %v261_v4 = vcombine.low %v239_v57, %v253_v61  ;;  %v262_v5 = vcombine.high %v239_v57, %v253_v61  ;;  %v102_v6 = vrot.slane %v74_v62, %v402_v12 }
  0x28   :  { %281 = vst [vmem:[#allocation5] sm:$0xff] %v273_v60  ;;  %v196_v7 = vcombine.high %v172_v22, %v176_v23  ;;  %283 = vst [vmem:[#allocation5 + $0x10] sm:$0xff] %v275_v1  ;;  %v210_v9 = vrot.slane %v194_v3, %v402_v12  ;;  %v108_v10 = vcombine.high %v58_v26, %v62_v27  ;;  %v35_v22 = vld [vmem:[#allocation2 + $0x30] sm:$0xff] }
  0x29   :  { %v110_v11 = vcombine.high %v66_v30, %v70_v31  ;;  %v230_v13 = vcombine.high %v180_v35, %v184_v40  ;;  %v274_v14 = vadd.f32 %v261_v4, %v152_v0  ;;  %v276_v15 = vadd.f32 %v262_v5, %v154_v2 }
  0x2a   :  { %v105_v16 = vcombine.low %v88_v63, %v102_v6  ;;  %v224_v17 = vrot.slane %v196_v7, %v402_v12  ;;  %v124_v18 = vrot.slane %v108_v10, %v402_v12  ;;  %v232_v20 = vcombine.high %v188_v43, %v192_v44 }
  0x2b   :  { %v138_v19 = vrot.slane %v110_v11, %v402_v12  ;;  %v246_v21 = vrot.slane %v230_v13, %v402_v12  ;;  %282 = vst [vmem:[#allocation5 + $0x8] sm:$0xff] %v274_v14  ;;  %284 = vst [vmem:[#allocation5 + $0x18] sm:$0xff] %v276_v15  ;;  %v106_v26 = vcombine.high %v88_v63, %v102_v6 }
  0x2c   :  { %v155_v23 = vmul.f32 %v105_v16, %v33_v8  ;;  %v227_v24 = vcombine.low %v210_v9, %v224_v17  ;;  %v228_v27 = vcombine.high %v210_v9, %v224_v17  ;;  %v260_v30 = vrot.slane %v232_v20, %v402_v12 }
  0x2d   :  { %v141_v29 = vcombine.low %v124_v18, %v138_v19  ;;  %v142_v31 = vcombine.high %v124_v18, %v138_v19  ;;  %v157_v33 = vmul.f32 %v106_v26, %v35_v22 }
  0x2e   :  { %v277_v32 = vadd.f32 %v227_v24, %v155_v23  ;;  %v263_v35 = vcombine.low %v246_v21, %v260_v30  ;;  %v264_v37 = vcombine.high %v246_v21, %v260_v30 }
  0x2f   :  { %v156_v34 = vmul.f32 %v141_v29, %v34_v25  ;;  %v158_v36 = vmul.f32 %v142_v31, %v36_v28  ;;  %v279_v38 = vadd.f32 %v228_v27, %v157_v33 }
  0x30   :  { %285 = vst [vmem:[#allocation5 + $0x20] sm:$0xff] %v277_v32 }
  0x31   :  { %v278_v39 = vadd.f32 %v263_v35, %v156_v34  ;;  %v280_v40 = vadd.f32 %v264_v37, %v158_v36  ;;  %287 = vst [vmem:[#allocation5 + $0x30] sm:$0xff] %v279_v38 }
  0x33   :  { %286 = vst [vmem:[#allocation5 + $0x28] sm:$0xff] %v278_v39  ;;  %288 = vst [vmem:[#allocation5 + $0x38] sm:$0xff] %v280_v40 }
  0x34   :  { %293 = vsyncadd [#allocation4], 768  ;;  %s363_s1 = smov [#allocation5]  }
  0x35   :  { %s294_s2 = sshll.u32 %s363_s1, 4  ;;  %s295_s2 = int_to_ptr.vmem [resolvable:$true] %s294_s2 }
  0x36   :  { %s333_s30 = scalar_lea.vmem %s295_s2, 256  ;;  %s337_s4 = scalar_lea.vmem %s295_s2, 1024 }
  0x37   :  { %p334_p8 = scmp.ne.s32.totalorder %s295_s2, %s333_s30  ;;  %p338_p9 = scmp.lt.s32.totalorder %s295_s2, %s295_s2 }
  0x38   :  { %p339_p10 = scmp.lt.s32.totalorder %s337_s4, %s333_s30 }
  0x3a   :  { %p340_p11 = por %p339_p10, %p338_p9 }
  0x3c   :  { %p341_p12 = pnand %p340_p11, %p334_p8 }
  0x3e   :  { %344 = shalt.err (!%p341_p12)
}
  0x3f   :  { %s345_s7 = scalar_lea.hbm %s441_s3, 256 }
  0x40   :  { %p346_p13 = scmp.ne.s32.totalorder %s441_s3, %s345_s7  ;;  %p349_p0 = scmp.lt.u32.totalorder %s345_s7, %s441_s3 }
  0x42   :  { %p351_p1 = pnand %p349_p0, %p346_p13 }
  0x44   :  { %354 = shalt.err (!%p351_p1)
}
  0x45   :  { %300 = dma.vmem_to_hbm [thread:$0]  %s295_s2, 256, %s441_s3, [#allocation4], %s360_s23, %s360_s23, %s361_s24  }
  0x46   :  { %357 = dma.done.wait [#allocation4], 1024  }
  0x47   :  { %358 = vsyncadd [#allocation4], 4294966272 }
  0x48   :  { %304 = vsyncpa [#allocation3], 1 }
  0x49   :  { %305 = vsyncpa [#allocation4], 1 }

// kernel: tpu_custom_call.1
= control target key start
LH: loop header
LB: loop body
LE: loop exit
PB: predicated region body
PF: predicated region fallthrough
CT: control target
= control target key end

     0   :  { %8 = vsyncpa [#allocation3], 0  ;;  %s538_s0 = inlined_call_operand.hbm [shape: f32[2,1024], index: 0, kind: input, shape index: {}]   ;;  %s539_s1 = inlined_call_operand.hbm [shape: f32[1,1024], index: 1, kind: input, shape index: {}]   ;;  %s540_s2 = inlined_call_operand.hbm [shape: f32[1,1024], index: 2, kind: input, shape index: {}]   ;;  %s541_s3 = inlined_call_operand.hbm [shape: f32[2,1024], index: 3, kind: output, shape index: {}]  }
   0x1   :  { %9 = vsyncpa [#allocation6], 0 }
   0x2   :  { %10 = vsyncpa [#allocation4], 0 }
   0x3   :  { %15 = vsyncadd [#allocation3], 768  ;;  %s431_s12 = smov [#allocation5]   ;;  %s432_s14 = smov [#allocation2]  }
   0x4   :  { %s29_s13 = sshll.u32 %s431_s12, 4  ;;  %s16_s15 = sshll.u32 %s432_s14, 4  ;;  %s30_s13 = int_to_ptr.vmem [resolvable:$true] %s29_s13  ;;  %s458_s15 = int_to_ptr.vmem [resolvable:$true] %s16_s15 }
   0x5   :  { %s337_s18 = scalar_lea.hbm %s539_s1, 128 }
   0x6   :  { %p338_p0 = scmp.ne.s32.totalorder %s539_s1, %s337_s18  ;;  %p341_p1 = scmp.lt.u32.totalorder %s337_s18, %s539_s1 }
   0x8   :  { %p343_p2 = pnand %p341_p1, %p338_p0 }
   0xa   :  { %346 = shalt.err (!%p343_p2)
}
   0xb   :  { %s347_s23 = scalar_lea.vmem %s30_s13, 128  ;;  %p352_p4 = scmp.lt.s32.totalorder %s30_s13, %s30_s13 }
   0xc   :  { %p348_p3 = scmp.ne.s32.totalorder %s30_s13, %s347_s23  ;;  %p353_p5 = scmp.lt.s32.totalorder %s347_s23, %s347_s23 }
   0xe   :  { %p354_p6 = por %p353_p5, %p352_p4 }
  0x10   :  { %p355_p7 = pnand %p354_p6, %p348_p3 }
  0x12   :  { %358 = shalt.err (!%p355_p7)
}
  0x13   :  { %32 = dma.hbm_to_vmem [thread:$0]  %s539_s1, 128, %s30_s13, [#allocation6]  }
  0x14   :  { %s359_s28 = scalar_lea.hbm %s538_s0, 256 }
  0x15   :  { %p360_p8 = scmp.ne.s32.totalorder %s538_s0, %s359_s28  ;;  %p363_p9 = scmp.lt.u32.totalorder %s359_s28, %s538_s0 }
  0x17   :  { %p365_p10 = pnand %p363_p9, %p360_p8 }
  0x19   :  { %368 = shalt.err (!%p365_p10)
}
  0x1a   :  { %s369_s6 = scalar_lea.vmem %s458_s15, 256  ;;  %s373_s1 = scalar_lea.vmem %s458_s15, 1024 }
  0x1b   :  { %p370_p11 = scmp.ne.s32.totalorder %s458_s15, %s369_s6  ;;  %p374_p12 = scmp.lt.s32.totalorder %s458_s15, %s458_s15 }
  0x1c   :  { %p375_p13 = scmp.lt.s32.totalorder %s373_s1, %s369_s6 }
  0x1e   :  { %p376_p0 = por %p375_p13, %p374_p12 }
  0x20   :  { %p377_p1 = pnand %p376_p0, %p370_p11 }
  0x22   :  { %380 = shalt.err (!%p377_p1)
}
  0x23   :  { %s433_s7 = smov 256   ;;  %s434_s8 = smov 16  }
  0x24   :  { %22 = dma.hbm_to_vmem [thread:$0]  %s538_s0, 256, %s458_s15, [#allocation3], %s433_s7, %s433_s7, %s434_s8  }
  0x25   :  { %s435_s11 = smov [#allocation7]   ;;  %s381_s16 = scalar_lea.hbm %s540_s2, 128 }
  0x26   :  { %s39_s12 = sshll.u32 %s435_s11, 4  ;;  %p382_p2 = scmp.ne.s32.totalorder %s540_s2, %s381_s16  ;;  %s40_s12 = int_to_ptr.vmem [resolvable:$true] %s39_s12 }
  0x27   :  { %p385_p3 = scmp.lt.u32.totalorder %s381_s16, %s540_s2 }
  0x29   :  { %p387_p4 = pnand %p385_p3, %p382_p2 }
  0x2b   :  { %390 = shalt.err (!%p387_p4)
}
  0x2c   :  { %s391_s21 = scalar_lea.vmem %s40_s12, 128  ;;  %p396_p6 = scmp.lt.s32.totalorder %s40_s12, %s40_s12 }
  0x2d   :  { %p392_p5 = scmp.ne.s32.totalorder %s40_s12, %s391_s21  ;;  %p397_p7 = scmp.lt.s32.totalorder %s391_s21, %s391_s21 }
  0x2f   :  { %p398_p8 = por %p397_p7, %p396_p6 }
  0x31   :  { %p399_p9 = pnand %p398_p8, %p392_p5 }
  0x33   :  { %402 = shalt.err (!%p399_p9)
}
  0x34   :  { %42 = dma.hbm_to_vmem [thread:$0]  %s540_s2, 128, %s40_s12, [#allocation6]  }
  0x35   :  { %425 = dma.done.wait [#allocation3], 1024  }
  0x36   :  { %426 = vsyncadd [#allocation3], 4294966272 }
  0x37   :  { %427 = dma.done.wait [#allocation6], 256  }
  0x38   :  { %428 = vsyncadd [#allocation6], 4294967040  ;;  %v62_v0 = vlaneseq  ;;  %v436_v1 = vmov 1983009808   ;;  %v60_v11 = vld [vmem:[#allocation7] sm:$0xff]  ;;  %v182_v13 = vld [vmem:[#allocation5] sm:$0xff] }
  0x39   :  { %v99_v2 = vunpack.c.l.s4 %v436_v1  ;;  %v52_v36 = vld [vmem:[#allocation2] sm:$0xff]  ;;  %v54_v45 = vld [vmem:[#allocation2 + $0x10] sm:$0xff]  ;;  %v53_v51 = vld [vmem:[#allocation2 + $0x8] sm:$0xff] }
  0x3a   :  { %v63_v3 = vshrl.u32 %v62_v0, 7  ;;  %v55_v54 = vld [vmem:[#allocation2 + $0x18] sm:$0xff] }
  0x3b   :  { %v100_v4 = vunpack.c.0.s8 %v99_v2 }
  0x3c   :  { %v64_v5 = vsub.s32 0, %v63_v3  ;;  %v68_v6 = vsub.s32 1, %v63_v3  ;;  %v72_v7 = vsub.s32 2, %v63_v3  ;;  %v76_v8 = vsub.s32 3, %v63_v3 }
  0x3d   :  { %v80_v9 = vsub.s32 4, %v63_v3  ;;  %v84_v10 = vsub.s32 5, %v63_v3  ;;  %v505_v12 = vsub.s32 %v100_v4, %v63_v3  ;;  %v88_v14 = vsub.s32 6, %v63_v3 }
  0x3e   :  { %v92_v15 = vsub.s32 7, %v63_v3  ;;  %v65_v16 = vrot.slane %v60_v11, %v64_v5  ;;  %v69_v17 = vrot.slane %v60_v11, %v68_v6  ;;  %v73_v18 = vrot.slane %v60_v11, %v72_v7 }
  0x3f   :  { %v77_v19 = vrot.slane %v60_v11, %v76_v8  ;;  %v187_v20 = vrot.slane %v182_v13, %v64_v5  ;;  %v191_v21 = vrot.slane %v182_v13, %v68_v6  ;;  %v195_v22 = vrot.slane %v182_v13, %v72_v7 }
  0x40   :  { %v199_v23 = vrot.slane %v182_v13, %v76_v8  ;;  %v94_v24 = vcombine.low %v65_v16, %v69_v17  ;;  %v81_v26 = vrot.slane %v60_v11, %v80_v9  ;;  %v85_v27 = vrot.slane %v60_v11, %v84_v10  ;;  %v56_v8 = vld [vmem:[#allocation2 + $0x20] sm:$0xff] }
  0x41   :  { %v96_v25 = vcombine.low %v73_v18, %v77_v19  ;;  %v216_v28 = vcombine.low %v187_v20, %v191_v21  ;;  %v89_v30 = vrot.slane %v60_v11, %v88_v14  ;;  %v93_v31 = vrot.slane %v60_v11, %v92_v15 }
  0x42   :  { %v218_v29 = vcombine.low %v195_v22, %v199_v23  ;;  %v104_v32 = vrot.slane %v94_v24, %v505_v12  ;;  %v130_v34 = vcombine.low %v81_v26, %v85_v27  ;;  %v203_v35 = vrot.slane %v182_v13, %v80_v9 }
  0x43   :  { %v118_v33 = vrot.slane %v96_v25, %v505_v12  ;;  %v226_v37 = vrot.slane %v216_v28, %v505_v12  ;;  %v132_v39 = vcombine.low %v89_v30, %v93_v31  ;;  %v207_v40 = vrot.slane %v182_v13, %v84_v10  ;;  %v57_v25 = vld [vmem:[#allocation2 + $0x28] sm:$0xff]  ;;  %v59_v28 = vld [vmem:[#allocation2 + $0x38] sm:$0xff] }
  0x44   :  { %v240_v38 = vrot.slane %v218_v29, %v505_v12  ;;  %v140_v42 = vrot.slane %v130_v34, %v505_v12  ;;  %v211_v43 = vrot.slane %v182_v13, %v88_v14  ;;  %v215_v44 = vrot.slane %v182_v13, %v92_v15 }
  0x45   :  { %v126_v41 = vcombine.low %v104_v32, %v118_v33  ;;  %v154_v47 = vrot.slane %v132_v39, %v505_v12  ;;  %v252_v48 = vcombine.low %v203_v35, %v207_v40  ;;  %v127_v49 = vcombine.high %v104_v32, %v118_v33 }
  0x46   :  { %v248_v46 = vcombine.low %v226_v37, %v240_v38  ;;  %v254_v52 = vcombine.low %v211_v43, %v215_v44  ;;  %v249_v53 = vcombine.high %v226_v37, %v240_v38  ;;  %v95_v55 = vcombine.high %v65_v16, %v69_v17 }
  0x47   :  { %v174_v50 = vmul.f32 %v126_v41, %v52_v36  ;;  %v162_v56 = vcombine.low %v140_v42, %v154_v47  ;;  %v262_v57 = vrot.slane %v252_v48, %v505_v12  ;;  %v176_v58 = vmul.f32 %v127_v49, %v54_v45 }
  0x48   :  { %v163_v59 = vcombine.high %v140_v42, %v154_v47  ;;  %v276_v61 = vrot.slane %v254_v52, %v505_v12  ;;  %v97_v62 = vcombine.high %v73_v18, %v77_v19  ;;  %v111_v63 = vrot.slane %v95_v55, %v505_v12 }
  0x49   :  { %v296_v60 = vadd.f32 %v248_v46, %v174_v50  ;;  %v175_v0 = vmul.f32 %v162_v56, %v53_v51  ;;  %v298_v1 = vadd.f32 %v249_v53, %v176_v58  ;;  %v217_v3 = vcombine.high %v187_v20, %v191_v21 }
  0x4a   :  { %v177_v2 = vmul.f32 %v163_v59, %v55_v54  ;;  %v284_v4 = vcombine.low %v262_v57, %v276_v61  ;;  %v285_v5 = vcombine.high %v262_v57, %v276_v61  ;;  %v125_v6 = vrot.slane %v97_v62, %v505_v12 }
  0x4b   :  { %304 = vst [vmem:[#allocation8] sm:$0xff] %v296_v60  ;;  %v219_v7 = vcombine.high %v195_v22, %v199_v23  ;;  %306 = vst [vmem:[#allocation8 + $0x10] sm:$0xff] %v298_v1  ;;  %v233_v9 = vrot.slane %v217_v3, %v505_v12  ;;  %v131_v10 = vcombine.high %v81_v26, %v85_v27  ;;  %v58_v22 = vld [vmem:[#allocation2 + $0x30] sm:$0xff] }
  0x4c   :  { %v133_v11 = vcombine.high %v89_v30, %v93_v31  ;;  %v253_v13 = vcombine.high %v203_v35, %v207_v40  ;;  %v297_v14 = vadd.f32 %v284_v4, %v175_v0  ;;  %v299_v15 = vadd.f32 %v285_v5, %v177_v2 }
  0x4d   :  { %v128_v16 = vcombine.low %v111_v63, %v125_v6  ;;  %v247_v17 = vrot.slane %v219_v7, %v505_v12  ;;  %v147_v18 = vrot.slane %v131_v10, %v505_v12  ;;  %v255_v20 = vcombine.high %v211_v43, %v215_v44 }
  0x4e   :  { %v161_v19 = vrot.slane %v133_v11, %v505_v12  ;;  %v269_v21 = vrot.slane %v253_v13, %v505_v12  ;;  %305 = vst [vmem:[#allocation8 + $0x8] sm:$0xff] %v297_v14  ;;  %307 = vst [vmem:[#allocation8 + $0x18] sm:$0xff] %v299_v15  ;;  %v129_v26 = vcombine.high %v111_v63, %v125_v6 }
  0x4f   :  { %v178_v23 = vmul.f32 %v128_v16, %v56_v8  ;;  %v250_v24 = vcombine.low %v233_v9, %v247_v17  ;;  %v251_v27 = vcombine.high %v233_v9, %v247_v17  ;;  %v283_v30 = vrot.slane %v255_v20, %v505_v12 }
  0x50   :  { %v164_v29 = vcombine.low %v147_v18, %v161_v19  ;;  %v165_v31 = vcombine.high %v147_v18, %v161_v19  ;;  %v180_v33 = vmul.f32 %v129_v26, %v58_v22 }
  0x51   :  { %v300_v32 = vadd.f32 %v250_v24, %v178_v23  ;;  %v286_v35 = vcombine.low %v269_v21, %v283_v30  ;;  %v287_v37 = vcombine.high %v269_v21, %v283_v30 }
  0x52   :  { %v179_v34 = vmul.f32 %v164_v29, %v57_v25  ;;  %v181_v36 = vmul.f32 %v165_v31, %v59_v28  ;;  %v302_v38 = vadd.f32 %v251_v27, %v180_v33 }
  0x53   :  { %308 = vst [vmem:[#allocation8 + $0x20] sm:$0xff] %v300_v32 }
  0x54   :  { %v301_v39 = vadd.f32 %v286_v35, %v179_v34  ;;  %v303_v40 = vadd.f32 %v287_v37, %v181_v36  ;;  %310 = vst [vmem:[#allocation8 + $0x30] sm:$0xff] %v302_v38 }
  0x56   :  { %309 = vst [vmem:[#allocation8 + $0x28] sm:$0xff] %v301_v39  ;;  %311 = vst [vmem:[#allocation8 + $0x38] sm:$0xff] %v303_v40 }
  0x57   :  { %316 = vsyncadd [#allocation4], 768  ;;  %s437_s2 = smov [#allocation8]  }
  0x58   :  { %s317_s22 = sshll.u32 %s437_s2, 4  ;;  %s318_s22 = int_to_ptr.vmem [resolvable:$true] %s317_s22 }
  0x59   :  { %s403_s23 = scalar_lea.vmem %s318_s22, 256  ;;  %s407_s24 = scalar_lea.vmem %s318_s22, 1024 }
  0x5a   :  { %p404_p10 = scmp.ne.s32.totalorder %s318_s22, %s403_s23  ;;  %p408_p11 = scmp.lt.s32.totalorder %s318_s22, %s318_s22 }
  0x5b   :  { %p409_p12 = scmp.lt.s32.totalorder %s407_s24, %s403_s23 }
  0x5d   :  { %p410_p13 = por %p409_p12, %p408_p11 }
  0x5f   :  { %p411_p0 = pnand %p410_p13, %p404_p10 }
  0x61   :  { %414 = shalt.err (!%p411_p0)
}
  0x62   :  { %s415_s27 = scalar_lea.hbm %s541_s3, 256 }
  0x63   :  { %p416_p1 = scmp.ne.s32.totalorder %s541_s3, %s415_s27  ;;  %p419_p2 = scmp.lt.u32.totalorder %s415_s27, %s541_s3 }
  0x65   :  { %p421_p3 = pnand %p419_p2, %p416_p1 }
  0x67   :  { %424 = shalt.err (!%p421_p3)
}
  0x68   :  { %323 = dma.vmem_to_hbm [thread:$0]  %s318_s22, 256, %s541_s3, [#allocation4], %s433_s7, %s433_s7, %s434_s8  }
  0x69   :  { %429 = dma.done.wait [#allocation4], 1024  }
  0x6a   :  { %430 = vsyncadd [#allocation4], 4294966272 }
  0x6b   :  { %327 = vsyncpa [#allocation3], 1 }
  0x6c   :  { %328 = vsyncpa [#allocation6], 1 }
  0x6d   :  { %329 = vsyncpa [#allocation4], 1 }

</bundles_post_ra>
